<compile_context>
chip_gen: v7x
topology: tpu7x:2x2x1
jax: 0.10.0
libtpu: 0.0.40
codegen_flags: <defaults>
</compile_context>

<pallas_src>
import math

import jax
import jax.numpy as jnp
from jax import lax
from jax.experimental import pallas as pl
from jax.experimental.pallas import tpu as pltpu


def _ada_ins_norm_kernel(x_ref, y_std_ref, y_mean_ref, o_ref):
    # x_ref:      (TR, HW)  row tile, rows are flattened (batch, channel) pairs
    # y_std_ref:  (TR, 1)   precomputed embedding std per row
    # y_mean_ref: (TR, 1)   precomputed embedding mean per row
    x = x_ref[...]                      # streaming dtype (f32 here; bf16 stays bf16)
    xf = x.astype(jnp.float32)
    n = xf.shape[-1]

    # Single pass: sum and sum-of-squares -> unbiased variance (torch.var default).
    s = jnp.sum(xf, axis=-1, keepdims=True)          # (TR, 1)
    sq = jnp.sum(xf * xf, axis=-1, keepdims=True)    # (TR, 1)
    mean = s * (1.0 / n)
    var = (sq - s * mean) * (1.0 / (n - 1))

    # NOTE: matching the reference exactly -- no eps before rsqrt.
    # TODO(synk): add eps to var if spatially-constant channels are possible.
    inv_std = lax.rsqrt(var)

    y_std = y_std_ref[...].astype(jnp.float32)
    y_mean = y_mean_ref[...].astype(jnp.float32)

    # out = (x - mean) / std * y_std + y_mean  ==  x * scale + bias
    scale = y_std * inv_std
    bias = y_mean - mean * scale

    o_ref[...] = (x * scale.astype(x.dtype) + bias.astype(x.dtype)).astype(o_ref.dtype)


def sinusoidal_pos_emb(t, dim):
    """SinusoidalPosEmb.forward: t shape (B,), returns (B, dim)."""
    half_dim = dim // 2
    scale = math.log(10000.0) / (half_dim - 1)
    freqs = jnp.exp(jnp.arange(half_dim, dtype=jnp.float32) * -scale)
    args = t[:, None].astype(jnp.float32) * freqs[None, :]
    return jnp.concatenate([jnp.sin(args), jnp.cos(args)], axis=-1)


def _round_up(a, b):
    return (a + b - 1) // b * b


def _pick_row_tile(num_rows, hw, itemsize, vmem_tile_budget=4 * 1024 * 1024):
    """Rows per block: multiple of 8, <= 256, one x-tile kept ~<= 4 MiB."""
    bytes_per_row = max(1, hw * itemsize)
    fit = max(8, (vmem_tile_budget // bytes_per_row) // 8 * 8)
    return int(min(256, fit, _round_up(num_rows, 8)))


def ada_ins_norm(x, timestep, *, num_classes=10, eps=1e-7):
    """AdaInsNorm.forward. x: (B, C, H, W), timestep: (B,)."""
    del num_classes, eps  # num_classes unused; eps declared but unused in c_norm
    B, C, H, W = x.shape
    HW = H * W
    rows = B * C

    # Tiny (B, C, 4) embedding stats are cheap XLA glue; pass per-row y_std/y_mean
    # instead of a lane-sparse 4-wide block.
    emb = sinusoidal_pos_emb(timestep, 4 * C).reshape(B, C, -1)
    m = emb.shape[-1]
    y_mean = jnp.mean(emb, axis=-1, keepdims=True)
    y_var = jnp.sum((emb - y_mean) ** 2, axis=-1, keepdims=True) / (m - 1)
    y_std = jnp.sqrt(y_var)
    y_mean = y_mean.reshape(rows, 1)
    y_std = y_std.reshape(rows, 1)

    x_rows = x.reshape(rows, HW)

    tr = _pick_row_tile(rows, HW, x.dtype.itemsize)
    rows_padded = _round_up(rows, tr)
    if rows_padded != rows:
        pad = rows_padded - rows
        x_rows = jnp.pad(x_rows, ((0, pad), (0, 0)))
        y_mean = jnp.pad(y_mean, ((0, pad), (0, 0)))
        y_std = jnp.pad(y_std, ((0, pad), (0, 0)))

    out_rows = pl.pallas_call(
        _ada_ins_norm_kernel,
        out_shape=jax.ShapeDtypeStruct((rows_padded, HW), x.dtype),
        grid_spec=pltpu.PrefetchScalarGridSpec(
            num_scalar_prefetch=0,
            grid=(rows_padded // tr,),
            in_specs=[
                pl.BlockSpec((tr, HW), lambda r: (r, 0)),
                pl.BlockSpec((tr, 1), lambda r: (r, 0)),
                pl.BlockSpec((tr, 1), lambda r: (r, 0)),
            ],
            out_specs=pl.BlockSpec((tr, HW), lambda r: (r, 0)),
        ),
        compiler_params=pltpu.CompilerParams(
            dimension_semantics=("parallel",),
            vmem_limit_bytes=32 * 1024 * 1024,
        ),
    )(x_rows, y_std, y_mean)

    return out_rows[:rows].reshape(B, C, H, W)


def _reference(x, timestep):
    """Pure-JAX reference for sanity check (two-pass centered stats)."""
    B, C, H, W = x.shape
    x_ = x.reshape(B, C, -1)
    emb = sinusoidal_pos_emb(timestep, 4 * C).reshape(B, C, -1)

    def stats(a):
        mean = jnp.mean(a, axis=-1, keepdims=True)
        var = jnp.sum((a - mean) ** 2, axis=-1, keepdims=True) / (a.shape[-1] - 1)
        return jnp.sqrt(var), mean

    x_std, x_mean = stats(x_)
    y_std, y_mean = stats(emb)
    out = (x_ - x_mean) / x_std * y_std + y_mean
    return out.reshape(B, C, H, W)


if __name__ == "__main__":
    key = jax.random.PRNGKey(0)
    kx, kt = jax.random.split(key)

    B, C, H, W = 2, 4, 16, 16
    x = jax.random.normal(kx, (B, C, H, W), dtype=jnp.float32)
    timestep = jax.random.uniform(kt, (B,), dtype=jnp.float32, minval=0.0, maxval=1000.0)

    out = ada_ins_norm(x, timestep)
    out = jax.block_until_ready(out)

    ref = _reference(x, timestep)
    assert out.shape == (B, C, H, W)
    assert jnp.allclose(out, ref, atol=1e-4, rtol=1e-4), "mismatch vs reference"

    print("KERNEL_OK")
</pallas_src>

<mosaic_0001>
module attributes {stable_mosaic.version = 11 : i64} {
  func.func @_ada_ins_norm_kernel(%arg0: i32, %arg1: memref<8x256xf32, #tpu.memory_space<vmem>>, %arg2: memref<8x1xf32, #tpu.memory_space<vmem>>, %arg3: memref<8x1xf32, #tpu.memory_space<vmem>>, %arg4: memref<8x256xf32, #tpu.memory_space<vmem>>) attributes {dimension_semantics = [#tpu.dimension_semantics<parallel>], iteration_bounds = array<i64: 1>, scalar_prefetch = 0 : i64, scratch_operands = 0 : i64, tpu.core_type = #tpu.core_type<tc>, window_params = [{transform_indices = @transform_0, window_bounds = array<i64: 8, 256>}, {transform_indices = @transform_1, window_bounds = array<i64: 8, 1>}, {transform_indices = @transform_2, window_bounds = array<i64: 8, 1>}, {transform_indices = @transform_3, window_bounds = array<i64: 8, 256>}]} {
    %c0 = arith.constant 0 : index
    %c0_0 = arith.constant 0 : index
    %0 = vector.load %arg1[%c0, %c0_0] : memref<8x256xf32, #tpu.memory_space<vmem>>, vector<8x256xf32>
    %cst = arith.constant dense<0.000000e+00> : vector<8xf32>
    %1 = vector.multi_reduction <add>, %0, %cst [1] : vector<8x256xf32> to vector<8xf32>
    %2 = vector.shape_cast %1 : vector<8xf32> to vector<8x1xf32>
    %3 = arith.mulf %0, %0 : vector<8x256xf32>
    %cst_1 = arith.constant dense<0.000000e+00> : vector<8xf32>
    %4 = vector.multi_reduction <add>, %3, %cst_1 [1] : vector<8x256xf32> to vector<8xf32>
    %5 = vector.shape_cast %4 : vector<8xf32> to vector<8x1xf32>
    %cst_2 = arith.constant 3.906250e-03 : f32
    %6 = vector.broadcast %cst_2 : f32 to vector<8x1xf32>
    %7 = arith.mulf %2, %6 : vector<8x1xf32>
    %8 = arith.mulf %2, %7 : vector<8x1xf32>
    %9 = arith.subf %5, %8 : vector<8x1xf32>
    %cst_3 = arith.constant 0.00392156886 : f32
    %10 = vector.broadcast %cst_3 : f32 to vector<8x1xf32>
    %11 = arith.mulf %9, %10 : vector<8x1xf32>
    %12 = math.rsqrt %11 : vector<8x1xf32>
    %c0_4 = arith.constant 0 : index
    %c0_5 = arith.constant 0 : index
    %13 = vector.load %arg2[%c0_4, %c0_5] : memref<8x1xf32, #tpu.memory_space<vmem>>, vector<8x1xf32>
    %c0_6 = arith.constant 0 : index
    %c0_7 = arith.constant 0 : index
    %14 = vector.load %arg3[%c0_6, %c0_7] : memref<8x1xf32, #tpu.memory_space<vmem>>, vector<8x1xf32>
    %15 = arith.mulf %13, %12 : vector<8x1xf32>
    %16 = arith.mulf %7, %15 : vector<8x1xf32>
    %17 = arith.subf %14, %16 : vector<8x1xf32>
    %18 = vector.broadcast %15 : vector<8x1xf32> to vector<8x256xf32>
    %19 = arith.mulf %0, %18 : vector<8x256xf32>
    %20 = vector.broadcast %17 : vector<8x1xf32> to vector<8x256xf32>
    %21 = arith.addf %19, %20 : vector<8x256xf32>
    %c0_8 = arith.constant 0 : index
    %c0_9 = arith.constant 0 : index
    %22 = vector.load %arg4[%c0_8, %c0_9] : memref<8x256xf32, #tpu.memory_space<vmem>>, vector<8x256xf32>
    tpu.vector_store %arg4[%c0_8, %c0_9], %21 {strides = array<i32>} : memref<8x256xf32, #tpu.memory_space<vmem>>, vector<8x256xf32>,
    return
  }
  func.func @transform_0(%arg0: i32) -> (i32, i32) {
    %c0_i32 = arith.constant 0 : i32
    %c0_i32_0 = arith.constant 0 : i32
    return %arg0, %c0_i32 : i32, i32
  }
  func.func @transform_1(%arg0: i32) -> (i32, i32) {
    %c0_i32 = arith.constant 0 : i32
    %c0_i32_0 = arith.constant 0 : i32
    return %arg0, %c0_i32 : i32, i32
  }
  func.func @transform_2(%arg0: i32) -> (i32, i32) {
    %c0_i32 = arith.constant 0 : i32
    %c0_i32_0 = arith.constant 0 : i32
    return %arg0, %c0_i32 : i32, i32
  }
  func.func @transform_3(%arg0: i32) -> (i32, i32) {
    %c0_i32 = arith.constant 0 : i32
    %c0_i32_0 = arith.constant 0 : i32
    return %arg0, %c0_i32 : i32, i32
  }
}

</mosaic_0001>

<bundles_post_ra>
// kernel: tpu_custom_call.1
= control target key start
LH: loop header
LB: loop body
LE: loop exit
PB: predicated region body
PF: predicated region fallthrough
CT: control target
= control target key end

     0   :  { %s141_s0 = inlined_call_operand.vmem [shape: f32[8,256], index: 0, kind: input, shape index: {}]   ;;  %s142_s1 = inlined_call_operand.vmem [shape: f32[8,1], index: 1, kind: input, shape index: {}]   ;;  %s143_s2 = inlined_call_operand.vmem [shape: f32[8,1], index: 2, kind: input, shape index: {}]   ;;  %s144_s3 = inlined_call_operand.hbm [shape: f32[8,256], index: 3, kind: output, shape index: {}]  }
   0x1   :  { %v15_v0 = vld [vmem:[%s141_s0] sm:$0xff]  ;;  %v16_v1 = vld [vmem:[%s141_s0 + $0x8] sm:$0xff] }
   0x2   :  { %8 = vsyncpa [#allocation3], 0  ;;  %v17_v2 = vadd.f32 %v16_v1, %v15_v0  ;;  %v20_v3 = vmul.f32 %v15_v0, %v15_v0  ;;  %v21_v4 = vmul.f32 %v16_v1, %v16_v1  ;;  %v95_v6 = vmov 0   ;;  %v30_v13 = vld [vmem:[%s142_s1] sm:$0xff]  ;;  %s96_s19 = smov [#allocation2]  }
   0x3   :  { %67 = vset.pattern.permute.xlu1 %v95_v6  ;;  %68 = vset.pattern.permute.xlu0 %v95_v6  ;;  %v31_v16 = vld [vmem:[%s143_s2] sm:$0xff]  ;;  %s57_s20 = sshll.u32 %s96_s19, 4  ;;  %s58_s20 = int_to_ptr.vmem [resolvable:$true] %s57_s20 }
   0x4   :  { %18 = vadd.xlane.f32.xlu0 %v17_v2  ;;  %v22_v5 = vadd.f32 %v21_v4, %v20_v3  ;;  %s71_s1 = scalar_lea.vmem %s58_s20, 256  ;;  %p76_p1 = scmp.lt.s32.totalorder %s58_s20, %s58_s20 }
   0x5   :  { %p72_p0 = scmp.ne.s32.totalorder %s58_s20, %s71_s1  ;;  %p77_p2 = scmp.lt.s32.totalorder %s71_s1, %s71_s1 }
   0x7   :  { %p78_p3 = por %p77_p2, %p76_p1 }
   0x8   :  { %23 = vadd.xlane.f32.xlu0 %v22_v5 }
   0x9   :  { %p79_p4 = pnand %p78_p3, %p72_p0 }
  0x91   :  { %v19_v7 = vpop.xlane.xlu0 %18 }
  0x92   :  { %v25_v8 = vmul.f32 0.00390625, %v19_v7 }
  0x94   :  { %v26_v9 = vmul.f32 %v25_v8, %v19_v7 }
  0x95   :  { %v24_v10 = vpop.xlane.xlu0 %23 }
  0x96   :  { %v27_v11 = vsub.f32 %v24_v10, %v26_v9 }
  0x98   :  { %v28_v12 = vmul.f32 0.003921569, %v27_v11 }
  0x9a   :  { %69 = vrsqrt.f32 %v28_v12 }
  0xa4   :  { %v70_v14 = vpop.eup %69 }
  0xa5   :  { %v32_v15 = vmul.f32 %v70_v14, %v30_v13 }
  0xa7   :  { %37 = vperm.xlu1 %67, %v32_v15   ;;  %v33_v17 = vmul.f32 %v32_v15, %v25_v8 }
  0xa9   :  { %v34_v18 = vsub.f32 %v31_v16, %v33_v17 }
  0xab   :  { %44 = vperm.xlu1 %67, %v34_v18  }
 0x126   :  { %v38_v19 = vpop.permute.xlu1 %37 }
 0x127   :  { %v40_v20 = vmul.f32 %v38_v19, %v15_v0  ;;  %v41_v21 = vmul.f32 %v38_v19, %v16_v1 }
 0x12a   :  { %v45_v22 = vpop.permute.xlu1 %44 }
 0x12b   :  { %v47_v23 = vadd.f32 %v45_v22, %v40_v20  ;;  %v48_v24 = vadd.f32 %v45_v22, %v41_v21 }
 0x12d   :  { %49 = vst [vmem:[#allocation2] sm:$0xff] %v47_v23  ;;  %50 = vst [vmem:[#allocation2 + $0x8] sm:$0xff] %v48_v24 }
 0x12e   :  { %82 = shalt.err (!%p79_p4)
}
 0x12f   :  { %s83_s22 = scalar_lea.hbm %s144_s3, 256 }
 0x130   :  { %p84_p5 = scmp.ne.s32.totalorder %s144_s3, %s83_s22  ;;  %p87_p6 = scmp.lt.u32.totalorder %s83_s22, %s144_s3 }
 0x132   :  { %p89_p7 = pnand %p87_p6, %p84_p5 }
 0x134   :  { %92 = shalt.err (!%p89_p7)
}
 0x135   :  { %60 = dma.vmem_to_hbm [thread:$0]  %s58_s20, 256, %s144_s3, [#allocation3]  }
 0x136   :  { %93 = dma.done.wait [#allocation3], 256  }
 0x137   :  { %94 = vsyncadd [#allocation3], 4294967040 }
 0x138   :  { %64 = vsyncpa [#allocation3], 1 }

</bundles_post_ra>
